<compile_context>
chip_gen: v7x
topology: tpu7x:2x2x1
jax: 0.10.0
libtpu: 0.0.40
codegen_flags: <defaults>
</compile_context>

<pallas_src>
import jax
import jax.numpy as jnp
from jax.experimental import pallas as pl
from jax.experimental.pallas import tpu as pltpu


# ---------------------------------------------------------------------------
# Pallas kernel: fused GEMM (channels x taps @ taps x spatial) + shift + ReLU
# ---------------------------------------------------------------------------
def conv_bn_relu_kernel(w_ref, shift_ref, patches_ref, out_ref):
    # w_ref: (Cout, K) with BN scale pre-folded; shift_ref: (Cout, 1)
    # patches_ref: (1, K, TM); out_ref: (1, Cout, TM)
    acc = jnp.dot(w_ref[...], patches_ref[0],
                  preferred_element_type=jnp.float32,
                  precision=jax.lax.Precision.HIGHEST)       # MXU: (Cout, TM)
    y = acc + shift_ref[...]                                  # folded bias+BN
    out_ref[0] = jnp.maximum(y, 0.0).astype(out_ref.dtype)    # ReLU


def _pick_tile_m(ohw, max_tm=16384):
    """Lane-axis tile size satisfying the (8,128) block rule.

    max_tm=16384 keeps the double-buffered working set (~9.2 MiB) under the
    default scoped-VMEM budget on every generation (v5e 16 MiB, v6e/v7x 32
    MiB) while amortizing the ~0.35us/step pipeline overhead.
    """
    if ohw % 128 == 0:
        return min(ohw, max_tm)          # multiple of 128
    if ohw <= max_tm:
        return ohw                       # full dim is always legal
    return max_tm                        # 128-multiple; Pallas masks the edge


def fused_conv_bn_relu(patches, w2d_scaled, shift):
    """patches: (N, K, OHW) f32; w2d_scaled: (Cout, K); shift: (Cout, 1)."""
    N, K, OHW = patches.shape
    Cout = w2d_scaled.shape[0]
    tm = _pick_tile_m(OHW)
    grid = (N, pl.cdiv(OHW, tm))         # >= 2 blocks for N >= 2 (megacore)

    cost = pl.CostEstimate(
        flops=2 * N * OHW * K * Cout,
        transcendentals=0,
        bytes_accessed=4 * (patches.size + w2d_scaled.size + shift.size
                            + N * Cout * OHW))

    return pl.pallas_call(
        conv_bn_relu_kernel,
        out_shape=jax.ShapeDtypeStruct((N, Cout, OHW), jnp.float32),
        grid_spec=pltpu.PrefetchScalarGridSpec(
            num_scalar_prefetch=0,
            grid=grid,
            in_specs=[
                pl.BlockSpec((Cout, K), lambda n, j: (0, 0)),    # resident
                pl.BlockSpec((Cout, 1), lambda n, j: (0, 0)),    # resident
                pl.BlockSpec((1, K, tm), lambda n, j: (n, 0, j)),
            ],
            out_specs=pl.BlockSpec((1, Cout, tm), lambda n, j: (n, 0, j)),
        ),
        compiler_params=pltpu.CompilerParams(
            dimension_semantics=("parallel", "parallel")),
        cost_estimate=cost,
    )(w2d_scaled, shift, patches)


# ---------------------------------------------------------------------------
# Glue: K-major im2col, parameter folding, layout plumbing
# ---------------------------------------------------------------------------
def im2col_3x3_s2_p1_kmajor(x):
    """x: (N, C, H, W) -> patches (N, C*9, OH*OW), plus (OH, OW).

    Taps stacked right after C, so K index = c*9 + kh*3 + kw, matching
    weight.reshape(Cout, C*9).  The long spatial axis lands last (lane axis);
    the final reshape is metadata-only.
    """
    N, C, H, W = x.shape
    OH = (H + 2 - 3) // 2 + 1
    OW = (W + 2 - 3) // 2 + 1
    x_pad = jnp.pad(x, ((0, 0), (0, 0), (1, 1), (1, 1)))
    taps = []
    for kh in range(3):
        for kw in range(3):
            taps.append(x_pad[:, :, kh:kh + 2 * OH:2, kw:kw + 2 * OW:2])
    p = jnp.stack(taps, axis=2)                    # (N, C, 9, OH, OW)
    return p.reshape(N, C * 9, OH * OW), OH, OW


def simple_extractor_forward(x, params):
    """x: (N, 1, H, W) float32 -> (N, 64, OH, OW) float32."""
    w, b, gamma, beta, run_mean, run_var, eps = params
    N, C, H, W = x.shape
    Cout = w.shape[0]

    patches, OH, OW = im2col_3x3_s2_p1_kmajor(x)   # (N, 9, OH*OW)

    # Fold conv bias + BatchNorm(running stats) into the weights (scale) and a
    # per-channel shift -> kernel epilogue is a single add + relu.
    inv_std = 1.0 / jnp.sqrt(run_var + eps)        # (64,)
    scale = gamma * inv_std                        # (64,)
    w2d_scaled = w.reshape(Cout, C * 9) * scale[:, None]
    shift = (beta + (b - run_mean) * scale).reshape(Cout, 1)

    out = fused_conv_bn_relu(patches, w2d_scaled, shift)  # (N, 64, OH*OW)
    return out.reshape(N, Cout, OH, OW)            # metadata-only -> NCHW


# ---------------------------------------------------------------------------
# Reference (pure JAX) for correctness check
# ---------------------------------------------------------------------------
def reference_forward(x, params):
    w, b, gamma, beta, run_mean, run_var, eps = params
    conv = jax.lax.conv_general_dilated(
        x, w, window_strides=(2, 2), padding=((1, 1), (1, 1)),
        dimension_numbers=("NCHW", "OIHW", "NCHW"),
        precision=jax.lax.Precision.HIGHEST)
    conv = conv + b.reshape(1, 64, 1, 1)
    bn = (conv - run_mean.reshape(1, 64, 1, 1)) / jnp.sqrt(
        run_var.reshape(1, 64, 1, 1) + eps)
    bn = bn * gamma.reshape(1, 64, 1, 1) + beta.reshape(1, 64, 1, 1)
    return jnp.maximum(bn, 0.0)


def _make_params(key):
    kw, kb, kg, kbe, km, kv = jax.random.split(key, 6)
    w = jax.random.normal(kw, (64, 1, 3, 3), dtype=jnp.float32) * 0.1
    b = jax.random.normal(kb, (64,), dtype=jnp.float32) * 0.1
    gamma = 1.0 + 0.1 * jax.random.normal(kg, (64,), dtype=jnp.float32)
    beta = 0.1 * jax.random.normal(kbe, (64,), dtype=jnp.float32)
    run_mean = 0.1 * jax.random.normal(km, (64,), dtype=jnp.float32)
    run_var = 1.0 + 0.1 * jax.random.uniform(kv, (64,), dtype=jnp.float32)
    return (w, b, gamma, beta, run_mean, run_var, 1e-5)


if __name__ == "__main__":
    key = jax.random.PRNGKey(0)
    kp, kx1, kx2 = jax.random.split(key, 3)
    params = _make_params(kp)

    # Primary small test (module expects 1 input channel).
    N, C, H, W = 2, 1, 16, 16
    x = jax.random.normal(kx1, (N, C, H, W), dtype=jnp.float32)
    out = jax.block_until_ready(simple_extractor_forward(x, params))
    ref = jax.block_until_ready(reference_forward(x, params))
    assert out.shape == (N, 64, H // 2, W // 2), out.shape
    assert jnp.allclose(out, ref, atol=1e-4, rtol=1e-4), \
        float(jnp.max(jnp.abs(out - ref)))

    # Secondary check: non-square spatial, OH*OW a 128-multiple (tiled branch).
    x2 = jax.random.normal(kx2, (2, 1, 64, 48), dtype=jnp.float32)
    out2 = jax.block_until_ready(simple_extractor_forward(x2, params))
    ref2 = jax.block_until_ready(reference_forward(x2, params))
    assert out2.shape == (2, 64, 32, 24), out2.shape
    assert jnp.allclose(out2, ref2, atol=1e-4, rtol=1e-4), \
        float(jnp.max(jnp.abs(out2 - ref2)))

    print("KERNEL_OK")
</pallas_src>

<mosaic_0001>
module attributes {stable_mosaic.version = 11 : i64} {
  func.func @conv_bn_relu_kernel(%arg0: i32, %arg1: i32, %arg2: memref<64x9xf32, #tpu.memory_space<vmem>>, %arg3: memref<64x1xf32, #tpu.memory_space<vmem>>, %arg4: memref<1x9x64xf32, #tpu.memory_space<vmem>>, %arg5: memref<1x64x64xf32, #tpu.memory_space<vmem>>) attributes {dimension_semantics = [#tpu.dimension_semantics<parallel>, #tpu.dimension_semantics<parallel>], iteration_bounds = array<i64: 2, 1>, scalar_prefetch = 0 : i64, scratch_operands = 0 : i64, tpu.core_type = #tpu.core_type<tc>, window_params = [{pipeline_mode = #tpu.pipeline_mode<synchronous>, transform_indices = @transform_0, window_bounds = array<i64: 64, 9>}, {pipeline_mode = #tpu.pipeline_mode<synchronous>, transform_indices = @transform_1, window_bounds = array<i64: 64, 1>}, {transform_indices = @transform_2, window_bounds = array<i64: 1, 9, 64>}, {transform_indices = @transform_3, window_bounds = array<i64: 1, 64, 64>}]} {
    %c0 = arith.constant 0 : index
    %c0_0 = arith.constant 0 : index
    %0 = vector.load %arg2[%c0, %c0_0] : memref<64x9xf32, #tpu.memory_space<vmem>>, vector<64x9xf32>
    %c0_1 = arith.constant 0 : index
    %c0_2 = arith.constant 0 : index
    %c0_3 = arith.constant 0 : index
    %1 = vector.load %arg4[%c0_1, %c0_2, %c0_3] : memref<1x9x64xf32, #tpu.memory_space<vmem>>, vector<1x9x64xf32>
    %2 = vector.shape_cast %1 : vector<1x9x64xf32> to vector<9x64xf32>
    %cst = arith.constant dense<0.000000e+00> : vector<64x64xf32>
    %3 = tpu.matmul %0, %2, %cst {dimension_numbers = #tpu.dot_dimension_numbers<[1], [0], [0], [1], [0, 0, 1, 1], [], []>, precision = #tpu.contract_precision<fp32>} : vector<64x9xf32>, vector<9x64xf32>, vector<64x64xf32> -> vector<64x64xf32>
    %c0_4 = arith.constant 0 : index
    %c0_5 = arith.constant 0 : index
    %4 = vector.load %arg3[%c0_4, %c0_5] : memref<64x1xf32, #tpu.memory_space<vmem>>, vector<64x1xf32>
    %5 = vector.broadcast %4 : vector<64x1xf32> to vector<64x64xf32>
    %6 = arith.addf %3, %5 : vector<64x64xf32>
    %cst_6 = arith.constant 0.000000e+00 : f32
    %7 = vector.broadcast %cst_6 : f32 to vector<64x64xf32>
    %8 = arith.maximumf %6, %7 : vector<64x64xf32>
    %c0_7 = arith.constant 0 : index
    %c0_8 = arith.constant 0 : index
    %c0_9 = arith.constant 0 : index
    %9 = vector.load %arg5[%c0_7, %c0_8, %c0_9] : memref<1x64x64xf32, #tpu.memory_space<vmem>>, vector<1x64x64xf32>
    %10 = vector.shape_cast %9 : vector<1x64x64xf32> to vector<64x64xf32>
    %11 = vector.shape_cast %8 : vector<64x64xf32> to vector<1x64x64xf32>
    tpu.vector_store %arg5[%c0_7, %c0_8, %c0_9], %11 {strides = array<i32>} : memref<1x64x64xf32, #tpu.memory_space<vmem>>, vector<1x64x64xf32>,
    return
  }
  func.func @transform_0(%arg0: i32, %arg1: i32) -> (i32, i32) {
    %c0_i32 = arith.constant 0 : i32
    %c0_i32_0 = arith.constant 0 : i32
    %c0_i32_1 = arith.constant 0 : i32
    return %c0_i32, %c0_i32_0 : i32, i32
  }
  func.func @transform_1(%arg0: i32, %arg1: i32) -> (i32, i32) {
    %c0_i32 = arith.constant 0 : i32
    %c0_i32_0 = arith.constant 0 : i32
    %c0_i32_1 = arith.constant 0 : i32
    return %c0_i32, %c0_i32_0 : i32, i32
  }
  func.func @transform_2(%arg0: i32, %arg1: i32) -> (i32, i32, i32) {
    %c0_i32 = arith.constant 0 : i32
    %c0_i32_0 = arith.constant 0 : i32
    return %arg0, %c0_i32, %arg1 : i32, i32, i32
  }
  func.func @transform_3(%arg0: i32, %arg1: i32) -> (i32, i32, i32) {
    %c0_i32 = arith.constant 0 : i32
    %c0_i32_0 = arith.constant 0 : i32
    return %arg0, %c0_i32, %arg1 : i32, i32, i32
  }
}

</mosaic_0001>

<bundles_post_ra>
// kernel: tpu_custom_call.1
= control target key start
LH: loop header
LB: loop body
LE: loop exit
PB: predicated region body
PF: predicated region fallthrough
CT: control target
= control target key end

     0   :  { %8 = vsyncpa [#allocation3], 0  ;;  %s1849_s0 = inlined_call_operand.vmem [shape: f32[64,9], index: 0, kind: input, shape index: {}]   ;;  %s1850_s1 = inlined_call_operand.vmem [shape: f32[64,1], index: 1, kind: input, shape index: {}]   ;;  %s1851_s2 = inlined_call_operand.vmem [shape: f32[2,9,64], index: 2, kind: input, shape index: {}]   ;;  %s1852_s3 = inlined_call_operand.hbm [shape: f32[2,64,64], index: 3, kind: output, shape index: {}]  }
   0x1   :  { %10 = vsyncpa [#allocation3 + $0x1], 0  ;;  %s1558_s12 = smov 0   ;;  %s1560_s13 = smov 0  }
   0x2   :  { %s1562_s14 = smov 0   ;;  %s1564_s15 = smov 0  }
   0x3   :  { %s1566_s16 = smov 0   ;;  %s1568_s17 = smov 0  }
   0x4 LB: > { %s1151_s18 = sadd.s32 4294967295, %s1532_s17   ;;  %s1152_s19 = sadd.s32 4294967294, %s1532_s17   ;;  %s1532_s17 = sphi %s1568_s17, %s16_s17   ;;  %s1528_s16 = sphi %s1566_s16, %s1859_s16   ;;  %s1524_s15 = sphi %s1564_s15, %s1858_s15   ;;  %s1520_s14 = sphi %s1562_s14, %s1857_s14   ;;  %s1516_s13 = sphi %s1560_s13, %s1856_s13   ;;  %s1512_s12 = sphi %s1558_s12, %s1855_s12  }
   0x5   : > { %s28_s20 = sadd.s32 1, %s1528_s16  ;;  %s107_s21 = sadd.s32 1, %s1520_s14 }
   0x6   : > { %p30_p0 = scmp.ge.s32.totalorder %s28_s20, 2  ;;  %p117_p1 = scmp.ne.s32.totalorder %s1520_s14, %s1516_s13 }
   0x7   : > { %p118_p2 = scmp.eq.s32.totalorder %s1151_s18, 1  ;;  %p123_p3 = scmp.ne.s32.totalorder %s1516_s13, %s1512_s12 }
   0x8   : > { %s1861_s20 = smov (%p30_p0, %s28_s20), 0  ;;  %p124_p5 = scmp.eq.s32.totalorder %s1152_s19, 1 }
   0x9   : > { %p1598_p4 = por %p118_p2, %p117_p1  ;;  %s102_s23 = ssub.s32 %s1528_s16, %s1861_s20 }
   0xa   : > { %p1155_p6 = scmp.ge.s32.totalorder %s1532_s17, 1  ;;  %p105_p7 = scmp.eq.s32.totalorder %s102_s23, 0 }
   0xb   : > { %p1605_p8 = por %p124_p5, %p123_p3  ;;  %p159_p9 = scmp.lt.s32.totalorder %s1532_s17, 3 }
   0xc   : > { %s1611_s25 = scalar_select %p105_p7, %s1520_s14, %s107_s21  }
   0xd   : > { %p160_p10 = pnand %p1155_p6, %p159_p9 }
   0xe   : > { %p186_p11 = scmp.lt.s32.totalorder (!%p160_p10), %s1524_s15, 1  ;;  %v194_v0 = vld [vmem:[%s1849_s0] sm:$0xff] (!%p160_p10)  ;;  %vm252_vm0 = vcmask (!%p160_p10), 72704   ;;  %v195_v1 = vld [vmem:[%s1849_s0 + $0x8] sm:$0xff] (!%p160_p10)  ;;  %v196_v2 = vld [vmem:[%s1849_s0 + $0x10] sm:$0xff] (!%p160_p10)  ;;  %vm277_vm1 = vcmask (!%p160_p10), 1040384  }
   0xf   : > { %163 = sbr.rel (%p160_p10) target bundleno = 314 (0x13a), region = 32  ;;  %v254_v3 = vsel (!%p160_p10), %vm252_vm0, %v194_v0, 0  ;;  %v257_v4 = vsel (!%p160_p10), %vm252_vm0, %v195_v1, 0  ;;  %v260_v5 = vsel (!%p160_p10), %vm252_vm0, %v196_v2, 0  ;;  %v197_v6 = vld [vmem:[%s1849_s0 + $0x18] sm:$0xff] (!%p160_p10)  ;;  %v198_v7 = vld [vmem:[%s1849_s0 + $0x20] sm:$0xff] (!%p160_p10) }
  0x10   : > { %v199_v8 = vld [vmem:[%s1849_s0 + $0x28] sm:$0xff] (!%p160_p10)  ;;  %v1636_v9 = vand.u32 (!%p160_p10), 4294901760, %v254_v3  ;;  %v1638_v10 = vand.u32 (!%p160_p10), 4294901760, %v257_v4  ;;  %v1640_v11 = vand.u32 (!%p160_p10), 4294901760, %v260_v5  ;;  %v263_v12 = vsel (!%p160_p10), %vm252_vm0, %v197_v6, 0  ;;  %v200_v13 = vld [vmem:[%s1849_s0 + $0x30] sm:$0xff] (!%p160_p10) }
  0x11   : > { %v1646_v14 = vand.u32 (!%p160_p10), 4294901760, %v263_v12  ;;  %v266_v15 = vsel (!%p160_p10), %vm252_vm0, %v198_v7, 0  ;;  %v269_v16 = vsel (!%p160_p10), %vm252_vm0, %v199_v8, 0  ;;  %v272_v23 = vsel (!%p160_p10), %vm252_vm0, %v200_v13, 0  ;;  %v201_v24 = vld [vmem:[%s1849_s0 + $0x38] sm:$0xff] (!%p160_p10)  ;;  %v206_v52 = vld [vmem:[%s1850_s1 + $0x10] sm:$0xff] (!%p160_p10) }
  0x12   : > { %v1651_v17 = vsub.f32 (!%p160_p10), %v254_v3, %v1636_v9  ;;  %v1654_v18 = vsub.f32 (!%p160_p10), %v257_v4, %v1638_v10  ;;  %v1657_v19 = vsub.f32 (!%p160_p10), %v260_v5, %v1640_v11  ;;  %v1659_v20 = vand.u32 (!%p160_p10), 4294901760, %v266_v15  ;;  %v204_v63 = vld [vmem:[%s1850_s1] sm:$0xff] (!%p160_p10)  ;;  %v207_v3 = vld [vmem:[%s1850_s1 + $0x18] sm:$0xff] (!%p160_p10)  ;;  %s183_s29 = sand.u32 (!%p160_p10), 1, %s1516_s13   ;;  %s1165_s5 = sshll.u32 (!%p160_p10), %s1524_s15, 10 }
  0x13   : > { %v1665_v21 = vsub.f32 (!%p160_p10), %v263_v12, %v1646_v14  ;;  %v1667_v22 = vand.u32 (!%p160_p10), 4294901760, %v269_v16  ;;  %v1686_v38 = vand.u32 (!%p160_p10), 4294901760, %v272_v23  ;;  %v275_v42 = vsel (!%p160_p10), %vm252_vm0, %v201_v24, 0  ;;  %s1156_s30 = sshll.u32 (!%p160_p10), %s183_s29, 6  ;;  %s1793_s9 = scalar_lea.hbm (!%p160_p10), %s1852_s3, %s1165_s5 }
  0x14   : > { %v350_v27 = vand.u32 (!%p160_p10), 4294901760, %v1651_v17  ;;  %v360_v28 = vand.u32 (!%p160_p10), 4294901760, %v1654_v18  ;;  %v370_v29 = vand.u32 (!%p160_p10), 4294901760, %v1657_v19  ;;  %v1677_v30 = vsub.f32 (!%p160_p10), %v266_v15, %v1659_v20  ;;  %s1774_s4 = scalar_lea.vmem (!%p160_p10), [#allocation2], %s1156_s30 }
  0x15   : > { %v380_v33 = vand.u32 (!%p160_p10), 4294901760, %v1665_v21  ;;  %v1682_v34 = vsub.f32 (!%p160_p10), %v269_v16, %v1667_v22  ;;  %v1698_v50 = vsub.f32 (!%p160_p10), %v272_v23, %v1686_v38  ;;  %v1700_v51 = vand.u32 (!%p160_p10), 4294901760, %v275_v42  ;;  %v205_v16 = vld [vmem:[%s1850_s1 + $0x8] sm:$0xff] (!%p160_p10)  ;;  %s1073_s6 = sshll.u32 (!%p160_p10), %s1774_s4, 4  ;;  %s1795_s6 = int_to_ptr.vmem [resolvable:$true] %s1073_s6 }
  0x16   : > { %s187_s11 = scalar_select %p186_p11, %s1524_s15, 1  ;;  %v351_v36 = vsub.f32 %v1651_v17, %v350_v27  ;;  %1278 = vmatprep.mubr.f32.mxu0 %v350_v27  ;;  %v361_v37 = vsub.f32 %v1654_v18, %v360_v28  ;;  %v371_v39 = vsub.f32 %v1657_v19, %v370_v29  ;;  %v390_v41 = vand.u32 4294901760, %v1677_v30  ;;  %v209_v23 = vld [vmem:[%s1850_s1 + $0x28] sm:$0xff]  ;;  %v210_v27 = vld [vmem:[%s1850_s1 + $0x30] sm:$0xff] }
  0x17   : > { %v381_v45 = vsub.f32 %v1665_v21, %v380_v33  ;;  %v400_v48 = vand.u32 4294901760, %v1682_v34  ;;  %v410_v57 = vand.u32 4294901760, %v1698_v50  ;;  %v1710_v58 = vsub.f32 %v275_v42, %v1700_v51  ;;  %s1803_s15 = scalar_lea.sflag [#allocation3], %s183_s29  ;;  %s1454_s10 = scalar_lea.vmem %s1795_s6, 1024 }
  0x18   : > { %s1164_s21 = sshll.u32 %s187_s11, 4  ;;  %v352_v44 = vand.u32 4294901760, %v351_v36  ;;  %v362_v49 = vand.u32 4294901760, %v361_v37  ;;  %v372_v53 = vand.u32 4294901760, %v371_v39  ;;  %v391_v56 = vsub.f32 %v1677_v30, %v390_v41  ;;  %p1455_p12 = scmp.ne.s32.totalorder %s1795_s6, %s1454_s10 }
  0x19   : > { %s193_s27 = scalar_lea.vmem %s1851_s2, %s1164_s21  ;;  %v1534_v59 = vmov 0   ;;  %v382_v0 = vand.u32 4294901760, %v381_v45  ;;  %v401_v1 = vsub.f32 %v1682_v34, %v400_v48  ;;  %v420_v2 = vand.u32 4294901760, %v1710_v58  ;;  %s1535_s11 = smov [#allocation2]  }
  0x1a   : > { %v202_v25 = vld [vmem:[%s193_s27] sm:$0xff]  ;;  %v203_v26 = vld [vmem:[%s193_s27 + $0x8] sm:$0x1]  ;;  %1230 = vmatprep.mubr.f32.mxu1 %v352_v44  ;;  %1453 = vset.pattern.permute.xlu1 %v1534_v59  ;;  %v392_v5 = vand.u32 4294901760, %v391_v56  ;;  %v411_v6 = vsub.f32 %v1698_v50, %v410_v57  ;;  %vm1049_vm2 = vcmask 523264   ;;  %p1456_p13 = pnand %p1455_p12, %p1598_p4  ;;  %s1458_s18 = sshll.u32 %s1535_s11, 4  ;;  %s1459_s18 = int_to_ptr.vmem [resolvable:$false] %s1458_s18 }
  0x1b   : > { %v279_v31 = vsel %vm277_vm1, %v203_v26, 0  ;;  %v282_v32 = vand.u32 4294901760, %v202_v25  ;;  %1452 = vset.pattern.permute.xlu0 %v1534_v59  ;;  %224 = vperm.xlu1 %1453, %v206_v52   ;;  %v402_v12 = vand.u32 4294901760, %v401_v1  ;;  %v421_v13 = vsub.f32 %v1710_v58, %v420_v2  ;;  %v211_v26 = vld [vmem:[%s1850_s1 + $0x38] sm:$0xff]  ;;  %s1460_s19 = scalar_lea.vmem %s1459_s18, 2048  ;;  %p1461_p1 = scmp.lt.s32.totalorder %s1795_s6, %s1459_s18 }
  0x1c   : > { %v285_v35 = vand.u32 4294901760, %v279_v31  ;;  %214 = vperm.xlu0 %1452, %v204_v63   ;;  %v412_v15 = vand.u32 4294901760, %v411_v6  ;;  %p1457_p0 = pneg %p1456_p13  ;;  %p1462_p2 = scmp.lt.s32.totalorder %s1460_s19, %s1454_s10 }
  0x1d   : > { %v430_v40 = vsub.f32 %v202_v25, %v282_v32  ;;  %v422_v24 = vand.u32 4294901760, %v421_v13  ;;  %v208_v25 = vld [vmem:[%s1850_s1 + $0x20] sm:$0xff] }
  0x1e   : > { %v1691_v43 = vpack.c.bf16 %v285_v35, %v282_v32  ;;  %v437_v47 = vsub.f32 %v279_v31, %v285_v35  ;;  %p1463_p3 = por %p1462_p2, %p1461_p1 }
  0x1f   : > { %v431_v46 = vand.u32 4294901760, %v430_v40  ;;  %229 = vperm.xlu1 %1453, %v207_v3  }
  0x20   : > { %1323 = vmatprep.subr.bf16.mxu1 %v1691_v43  ;;  %1335 = vmatprep.subr.bf16.mxu0 %v1691_v43  ;;  %v438_v55 = vand.u32 4294901760, %v437_v47  ;;  %v1330_v8 = vpack.c.bf16 %v437_v47, %v430_v40  ;;  %p1464_p5 = pnand %p1463_p3, %p1457_p0 }
  0x21   : > { %1325 = vmatpush3.bf16.msra.mxu1 %v1691_v43  ;;  %1337 = vmatpush3.bf16.msra.mxu0 %v1691_v43  ;;  %v432_v54 = vsub.f32 %v430_v40, %v431_v46 }
  0x22   : > { %v439_v61 = vsub.f32 %v437_v47, %v438_v55  ;;  %v1338_v62 = vpack.c.bf16 %v438_v55, %v431_v46  ;;  %219 = vperm.xlu0 %1452, %v205_v16  }
  0x23   : > { %v433_v60 = vand.u32 4294901760, %v432_v54  ;;  %239 = vperm.xlu1 %1453, %v209_v23  }
  0x24   : > { %1231 = vmatmul.mubr.f32.vlgmr.msra.gmra.mrb[0].mxu1 %v362_v49  ;;  %1279 = vmatmul.mubr.f32.vlgmr.msra.gmra.mrb[0].mxu0 %v360_v28  ;;  %v440_v4 = vand.u32 4294901760, %v439_v61 }
  0x25   : > { %1233 = vmatprep.mubr.f32.mxu1 %v372_v53  ;;  %1281 = vmatprep.mubr.f32.mxu0 %v370_v29 }
  0x26   : > { %1339 = vmatprep.subr.bf16.mxu0 %v1338_v62  ;;  %v1326_v7 = vpack.c.bf16 %v440_v4, %v433_v60  ;;  %234 = vperm.xlu0 %1452, %v208_v25  }
  0x27   : > { %1341 = vmatpush3.bf16.msra.mxu0 %v1338_v62  ;;  %249 = vperm.xlu1 %1453, %v211_v26  }
  0x28   : > { %1234 = vmatmul.mubr.f32.gmra.mrb[2].mxu1 %v382_v0  ;;  %1282 = vmatmul.mubr.f32.gmra.mrb[2].mxu0 %v380_v33 }
  0x29   : > { %1327 = vmatprep.subr.bf16.mxu1 %v1326_v7  ;;  %1236 = vmatprep.mubr.f32.mxu1 %v392_v5 }
  0x2a   : > { %1329 = vmatpush3.bf16.msra.mxu1 %v1326_v7  ;;  %1284 = vmatprep.mubr.f32.mxu0 %v390_v41 }
  0x2b   : > { %1331 = vmatprep.subr.bf16.mxu1 %v1330_v8  ;;  %1343 = vmatprep.subr.bf16.mxu0 %v1691_v43 }
  0x2c   : > { %1237 = vmatmul.mubr.f32.gmra.mrb[4].mxu1 %v402_v12  ;;  %1285 = vmatmul.mubr.f32.gmra.mrb[4].mxu0 %v400_v48 }
  0x2d   : > { %1239 = vmatprep.mubr.f32.mxu1 %v412_v15  ;;  %1287 = vmatprep.mubr.f32.mxu0 %v410_v57 }
  0x2e   : > { %244 = vperm.xlu0 %1452, %v210_v27  }
  0x30   : > { %1240 = vmatmul.mubr.f32.gmra.mrb[6].mxu1 %v422_v24  ;;  %1288 = vmatmul.mubr.f32.gmra.mrb[6].mxu0 %v420_v2 }
  0x31   : > { %1246 = vmatprep.mubr.f32.mxu1 %v1636_v9  ;;  %1294 = vmatprep.mubr.f32.mxu0 %v1636_v9 }
  0x34   : > { %1247 = vmatmul.mubr.f32.vlgmr.msra.gmra.mrb[0].mxu1 %v1638_v10  ;;  %1295 = vmatmul.mubr.f32.vlgmr.msra.gmra.mrb[0].mxu0 %v1638_v10 }
  0x35   : > { %1249 = vmatprep.mubr.f32.mxu1 %v1640_v11  ;;  %1297 = vmatprep.mubr.f32.mxu0 %v1640_v11 }
  0x36   : > { %1333 = vmatpush3.bf16.msra.mxu1 %v1330_v8  ;;  %1345 = vmatpush3.bf16.msra.mxu0 %v1691_v43 }
  0x38   : > { %1250 = vmatmul.mubr.f32.gmra.mrb[2].mxu1 %v1646_v14  ;;  %1298 = vmatmul.mubr.f32.gmra.mrb[2].mxu0 %v1646_v14 }
  0x39   : > { %1252 = vmatprep.mubr.f32.mxu1 %v1659_v20  ;;  %1300 = vmatprep.mubr.f32.mxu0 %v1659_v20 }
  0x3c   : > { %1253 = vmatmul.mubr.f32.gmra.mrb[4].mxu1 %v1667_v22  ;;  %1301 = vmatmul.mubr.f32.gmra.mrb[4].mxu0 %v1667_v22 }
  0x3d   : > { %1255 = vmatprep.mubr.f32.mxu1 %v1686_v38  ;;  %1303 = vmatprep.mubr.f32.mxu0 %v1686_v38 }
  0x40   : > { %1256 = vmatmul.mubr.f32.gmra.mrb[6].mxu1 %v1700_v51  ;;  %1304 = vmatmul.mubr.f32.gmra.mrb[6].mxu0 %v1700_v51 }
  0x41   : > { %1262 = vmatprep.mubr.f32.mxu1 %v1651_v17  ;;  %1310 = vmatprep.mubr.f32.mxu0 %v1636_v9 }
  0x44   : > { %1263 = vmatmul.mubr.f32.vlgmr.msra.gmra.mrb[0].mxu1 %v1654_v18  ;;  %1311 = vmatmul.mubr.f32.vlgmr.msra.gmra.mrb[0].mxu0 %v1638_v10 }
  0x45   : > { %1265 = vmatprep.mubr.f32.mxu1 %v1657_v19  ;;  %1313 = vmatprep.mubr.f32.mxu0 %v1640_v11 }
  0x48   : > { %1266 = vmatmul.mubr.f32.gmra.mrb[2].mxu1 %v1665_v21  ;;  %1314 = vmatmul.mubr.f32.gmra.mrb[2].mxu0 %v1646_v14 }
  0x49   : > { %1268 = vmatprep.mubr.f32.mxu1 %v1677_v30  ;;  %1316 = vmatprep.mubr.f32.mxu0 %v1659_v20 }
  0x4c   : > { %1269 = vmatmul.mubr.f32.gmra.mrb[4].mxu1 %v1682_v34  ;;  %1317 = vmatmul.mubr.f32.gmra.mrb[4].mxu0 %v1667_v22 }
  0x4d   : > { %1271 = vmatprep.mubr.f32.mxu1 %v1698_v50  ;;  %1319 = vmatprep.mubr.f32.mxu0 %v1686_v38 }
  0x50   : > { %1272 = vmatmul.mubr.f32.gmra.mrb[6].mxu1 %v1710_v58  ;;  %1320 = vmatmul.mubr.f32.gmra.mrb[6].mxu0 %v1700_v51 }
  0x9a   : > { %v225_v9 = vpop.permute.xlu1 %224 }
  0x9b   : > { %v215_v10 = vpop.permute.xlu0 %214 }
  0x9e   : > { %v230_v11 = vpop.permute.xlu1 %229 }
  0xa1   : > { %v220_v14 = vpop.permute.xlu0 %219 }
  0xa2   : > { %v240_v29 = vpop.permute.xlu1 %239 }
  0xa5   : > { %v235_v30 = vpop.permute.xlu0 %234 }
  0xa6   : > { %v250_v50 = vpop.permute.xlu1 %249 }
  0xad   : > { %v245_v51 = vpop.permute.xlu0 %244 }
 0x117   : > { %v1264_v17 = vpop.f32.mrb[0].mxu1  ;;  %v1312_v18 = vpop.f32.mrb[0].mxu0 }
 0x118   : > { %v1346_v19 = vadd.f32 %v1264_v17, %v220_v14  ;;  %v623_v20 = vpop.f32.mrb[1].mxu1  ;;  %v995_v21 = vpop.f32.mrb[1].mxu0 }
 0x119   : > { %v1348_v22 = vadd.f32 %v623_v20, %v215_v10 }
 0x11a   : > { %v1347_v28 = vadd.f32 %v1346_v19, %v1312_v18 }
 0x11b   : > { %v1349_v31 = vadd.f32 %v1348_v22, %v995_v21  ;;  %v1267_v32 = vpop.f32.mrb[2].mxu1  ;;  %v1315_v33 = vpop.f32.mrb[2].mxu0 }
 0x11c   : > { %v1042_v34 = vmax.f32 %v1347_v28, 0.0  ;;  %v1350_v35 = vadd.f32 %v1267_v32, %v230_v11  ;;  %v637_v36 = vpop.f32.mrb[3].mxu1  ;;  %v1007_v37 = vpop.f32.mrb[3].mxu0 }
 0x11d   : > { %v1041_v38 = vmax.f32 %v1349_v31, 0.0  ;;  %v1352_v39 = vadd.f32 %v637_v36, %v225_v9 }
 0x11e   : > { %1051 = vst.msk [vmem:[%s1774_s4 + $0x8] sm:$0xff] %vm1049_vm2, %v1042_v34  ;;  %v1351_v40 = vadd.f32 %v1350_v35, %v1315_v33 }
 0x11f   : > { %1050 = vst.msk [vmem:[%s1774_s4] sm:$0xff] %vm1049_vm2, %v1041_v38  ;;  %v1353_v41 = vadd.f32 %v1352_v39, %v1007_v37  ;;  %v1270_v42 = vpop.f32.mrb[4].mxu1  ;;  %v1318_v43 = vpop.f32.mrb[4].mxu0 }
 0x120   : > { %v1044_v44 = vmax.f32 %v1351_v40, 0.0  ;;  %v1354_v45 = vadd.f32 %v1270_v42, %v240_v29  ;;  %v651_v46 = vpop.f32.mrb[5].mxu1  ;;  %v1019_v47 = vpop.f32.mrb[5].mxu0 }
 0x121   : > { %v1043_v48 = vmax.f32 %v1353_v41, 0.0  ;;  %v1356_v49 = vadd.f32 %v651_v46, %v235_v30 }
 0x122   : > { %1053 = vst.msk [vmem:[%s1774_s4 + $0x18] sm:$0xff] %vm1049_vm2, %v1044_v44  ;;  %v1355_v52 = vadd.f32 %v1354_v45, %v1318_v43 }
 0x123   : > { %1052 = vst.msk [vmem:[%s1774_s4 + $0x10] sm:$0xff] %vm1049_vm2, %v1043_v48  ;;  %v1357_v53 = vadd.f32 %v1356_v49, %v1019_v47  ;;  %v1273_v54 = vpop.f32.mrb[6].mxu1  ;;  %v1321_v55 = vpop.f32.mrb[6].mxu0 }
 0x124   : > { %v1046_v56 = vmax.f32 %v1355_v52, 0.0  ;;  %v1358_v57 = vadd.f32 %v1273_v54, %v250_v50  ;;  %v665_v58 = vpop.f32.mrb[7].mxu1  ;;  %v1031_v59 = vpop.f32.mrb[7].mxu0 }
 0x125   : > { %v1045_v60 = vmax.f32 %v1357_v53, 0.0  ;;  %v1360_v61 = vadd.f32 %v665_v58, %v245_v51 }
 0x126   : > { %1055 = vst.msk [vmem:[%s1774_s4 + $0x28] sm:$0xff] %vm1049_vm2, %v1046_v56  ;;  %v1359_v62 = vadd.f32 %v1358_v57, %v1321_v55 }
 0x127   : > { %1054 = vst.msk [vmem:[%s1774_s4 + $0x20] sm:$0xff] %vm1049_vm2, %v1045_v60  ;;  %v1361_v63 = vadd.f32 %v1360_v61, %v1031_v59 }
 0x128   : > { %v1048_v0 = vmax.f32 %v1359_v62, 0.0 }
 0x129   : > { %v1047_v1 = vmax.f32 %v1361_v63, 0.0 }
 0x12a   : > { %1057 = vst.msk [vmem:[%s1774_s4 + $0x38] sm:$0xff] %vm1049_vm2, %v1048_v0 }
 0x12b   : > { %1056 = vst.msk [vmem:[%s1774_s4 + $0x30] sm:$0xff] %vm1049_vm2, %v1047_v1 }
 0x12c   : > { %1467 = shalt.err (!%p1464_p5)
}
 0x12d   : > { %s1468_s21 = scalar_lea.hbm %s1793_s9, 1024  ;;  %s1472_s27 = scalar_lea.hbm %s1852_s3, 2048 }
 0x12e   : > { %p1469_p6 = scmp.ne.s32.totalorder %s1793_s9, %s1468_s21  ;;  %p1473_p10 = scmp.lt.u32.totalorder %s1793_s9, %s1852_s3 }
 0x12f   : > { %p1474_p11 = scmp.lt.u32.totalorder %s1472_s27, %s1468_s21  ;;  %p1476_p13 = scmp.lt.u32.totalorder %s1468_s21, %s1793_s9 }
 0x130   : > { %p1470_p7 = pnand %p1469_p6, %p1598_p4 }
 0x131   : > { %p1475_p12 = por %p1474_p11, %p1473_p10 }
 0x132   : > { %p1471_p9 = pneg %p1470_p7 }
 0x133   : > { %p1477_p0 = por %p1476_p13, %p1475_p12 }
 0x135   : > { %p1478_p1 = pnand %p1477_p0, %p1471_p9 }
 0x137   : > { %1481 = shalt.err (!%p1478_p1)
}
 0x138   : > { %s1536_s30 = smov 128   ;;  %s1537_s4 = smov 8  }
 0x139   : > { %1394 = dma.vmem_to_hbm [thread:$0]  (%p1598_p4), %s1795_s6, 1024, %s1793_s9, %s1803_s15, %s1536_s30, %s1536_s30, %s1537_s4  }
 0x13a PF: > { %p1400_p2 = scmp.ge.s32.totalorder %s1532_s17, 2  ;;  %s1088_s5 = sand.u32 1, %s1512_s12  }
 0x13b   : > { %s1089_s7 = scalar_lea.sflag [#allocation3], %s1088_s5 }
 0x13c   : > { %p1397_p3 = pnand %p1400_p2, %p1605_p8 }
 0x13e   : > { %1507 = dma.done.wait (!%p1397_p3), %s1089_s7, 1024  }
 0x13f   : > { %1509 = vsyncadd (!%p1397_p3), %s1089_s7, 4294966272  ;;  %s16_s17 = sadd.s32 1, %s1532_s17   ;;  %s1855_s12 = smov %s1516_s13 }
 0x140   : > { %p13_p5 = scmp.ge.s32.totalorder %s16_s17, 4   ;;  %s1856_s13 = smov %s1520_s14 }
 0x141   : > { %s1857_s14 = smov %s1611_s25  ;;  %s1858_s15 = smov %s1528_s16 }
 0x142   : > { %s1859_s16 = smov %s1861_s20  ;;  %15 = sbr.rel (!%p13_p5) target bundleno = 4 (0x4), region = 67 }
 0x149   :  { %1094 = vsyncpa [#allocation3], 1 }
 0x14a   :  { %1096 = vsyncpa [#allocation3 + $0x1], 1 }

</bundles_post_ra>
